<compile_context>
chip_gen: v5e
topology: v5e:2x2
jax: 0.10.0
libtpu: 0.0.40
codegen_flags: <defaults>
</compile_context>

<pallas_src>
import functools

import jax
import jax.numpy as jnp
from jax import lax
from jax.experimental import pallas as pl
from jax.experimental.pallas import tpu as pltpu


def _w2v_lse_kernel(*refs, bidirectional, block_kv, ys_resident):
    """One (row-tile i, col-tile j) step of the tiled contrastive-CE logsumexp.

    Inputs : xs (tm, H) row tile, ys ((B, H) resident or (tn, H) tile).
    Outputs: row_lse (tm, 1) per-row logsumexp  [+ col_lse_sum (1, 1) scalar].
    """
    if bidirectional:
        (xs_ref, ys_ref, row_lse_ref, col_sum_ref,
         m_row, l_row, m_col, l_col, acc_col) = refs
    else:
        xs_ref, ys_ref, row_lse_ref, m_row, l_row = refs
        col_sum_ref = m_col = l_col = acc_col = None

    i = pl.program_id(0)          # row-tile index (outer)
    j = pl.program_id(1)          # col-tile index (inner: reduction for rows)
    ni = pl.num_programs(0)
    nj = pl.num_programs(1)

    xs = xs_ref[...]                                   # (tm, H), bf16/f32
    if ys_resident:
        start = pl.multiple_of(j * block_kv, block_kv)
        ys = ys_ref[pl.ds(start, block_kv), :]         # (tn, H) slice of resident ys
    else:
        ys = ys_ref[...]                               # (tn, H)

    # (tm, tn) logits tile on the MXU; contract the last dims of both operands
    # (no ys.T relayout, no pre-MXU upcast); accumulate in f32.
    logits = lax.dot_general(
        xs, ys,
        dimension_numbers=(((1,), (1,)), ((), ())),
        preferred_element_type=jnp.float32)

    # ---- reset row-direction online-LSE state at the start of each row tile --
    @pl.when(j == 0)
    def _():
        m_row[...] = jnp.full_like(m_row, -jnp.inf)
        l_row[...] = jnp.zeros_like(l_row)

    if not bidirectional:
        # Standard flash-style per-row shift: one exp pass over the tile.
        m_prev = m_row[...]
        m_new = jnp.maximum(m_prev, jnp.max(logits, axis=1, keepdims=True))
        p = jnp.exp(logits - m_new)
        l_row[...] = (l_row[...] * jnp.exp(m_prev - m_new)
                      + jnp.sum(p, axis=1, keepdims=True))
        m_row[...] = m_new
    else:
        # Single exp pass shared by the row- and column-direction sums, shifted
        # by the scalar tile max (numerics slightly looser than a per-row shift;
        # validated against the reference in __main__).
        m_t = jnp.max(jnp.max(logits, axis=1, keepdims=True),
                      axis=0, keepdims=True)                       # (1, 1)
        p = jnp.exp(logits - m_t)                                  # one EUP pass
        row_s = jnp.sum(p, axis=1, keepdims=True)                  # (tm, 1)
        col_s = jnp.sum(p, axis=0, keepdims=True)                  # (1, tn)

        # rows (reduction over inner axis j)
        m_prev = m_row[...]
        m_new = jnp.maximum(m_prev, m_t)
        l_row[...] = (l_row[...] * jnp.exp(m_prev - m_new)
                      + row_s * jnp.exp(m_t - m_new))
        m_row[...] = m_new

        # columns (state persists in scratch across row tiles i)
        @pl.when(jnp.logical_and(i == 0, j == 0))
        def _():
            acc_col[...] = jnp.zeros_like(acc_col)

        @pl.when(i == 0)
        def _():
            m_col[j] = jnp.full((1, block_kv), -jnp.inf, jnp.float32)
            l_col[j] = jnp.zeros((1, block_kv), jnp.float32)

        mc_prev = m_col[j]                                         # (1, tn)
        mc_new = jnp.maximum(mc_prev, m_t)
        lc_new = (l_col[j] * jnp.exp(mc_prev - mc_new)
                  + col_s * jnp.exp(m_t - mc_new))
        m_col[j] = mc_new
        l_col[j] = lc_new

        @pl.when(i == ni - 1)
        def _():
            lse_col = mc_new + jnp.log(lc_new)                     # (1, tn)
            acc_col[...] += jnp.sum(lse_col, axis=-1, keepdims=True)

        @pl.when(jnp.logical_and(i == ni - 1, j == nj - 1))
        def _():
            col_sum_ref[...] = acc_col[...]

    # ---- finalize the row-direction LSE once the inner reduction is done ----
    @pl.when(j == nj - 1)
    def _():
        row_lse_ref[...] = m_row[...] + jnp.log(l_row[...])        # (tm, 1)


_BLOCK_CANDIDATES = (256, 128, 64, 32, 16, 8)   # <=256: logits tile <= vreg file


def _pick_block(b, requested):
    if requested is not None:
        bs = int(requested)
        if b % bs != 0 or not (bs == b or bs % 8 == 0):
            raise ValueError(f"block size {bs} incompatible with batch {b}")
        return bs
    for cand in _BLOCK_CANDIDATES:
        if b % cand == 0:
            return cand
    # TODO(synk): pad the batch to a multiple of 8 (with masked rows/columns)
    # instead of falling back to a single (B, B) tile for awkward batch sizes.
    return b


def word2vec_loss_pallas(xs_embed, ys_embed, *, use_bidirectional_loss=False,
                         block_q=None, block_kv=None,
                         compute_dtype=jnp.bfloat16, ys_resident=None):
    """(B, H), (B, H) -> scalar f32 in-batch contrastive CE loss."""
    b, h = xs_embed.shape
    assert ys_embed.shape == (b, h), (xs_embed.shape, ys_embed.shape)

    # bf16 operands by default: half the DMA bytes, native MXU rate on all
    # generations (v7x MXU has no int path, so bf16 is the portable choice).
    xs_c = xs_embed.astype(compute_dtype)
    ys_c = ys_embed.astype(compute_dtype)

    # Gold (diagonal) logits are O(B*H): compute them once here instead of in
    # the kernel.  This removes a predicated elementwise pass from the hot loop
    # and decouples tm from tn.
    diag = jnp.sum(xs_c.astype(jnp.float32) * ys_c.astype(jnp.float32),
                   axis=-1)                                        # (B,)

    tm = _pick_block(b, block_q)
    tn = _pick_block(b, block_kv)
    ni, nj = b // tm, b // tn

    if ys_resident is None:
        # Keep ys fully VMEM-resident (fetched once, no per-i re-streaming)
        # whenever it is small; 4 MiB is well inside the default scoped-VMEM
        # budget on v5e/v6e/v7x even with Pallas double-buffering.
        ys_resident = (b * h * jnp.dtype(compute_dtype).itemsize) <= (4 << 20)

    if ys_resident:
        ys_spec = pl.BlockSpec((b, h), lambda i, j: (0, 0))        # fetched once
    else:
        ys_spec = pl.BlockSpec((tn, h), lambda i, j: (j, 0))

    in_specs = [pl.BlockSpec((tm, h), lambda i, j: (i, 0)), ys_spec]

    out_shape = [jax.ShapeDtypeStruct((b, 1), jnp.float32)]        # row lse
    out_specs = [pl.BlockSpec((tm, 1), lambda i, j: (i, 0))]
    scratch_shapes = [pltpu.VMEM((tm, 1), jnp.float32),            # m_row
                      pltpu.VMEM((tm, 1), jnp.float32)]            # l_row

    if use_bidirectional_loss:
        out_shape.append(jax.ShapeDtypeStruct((1, 1), jnp.float32))    # sum col lse
        out_specs.append(pl.BlockSpec((1, 1), lambda i, j: (0, 0)))
        scratch_shapes += [pltpu.VMEM((nj, 1, tn), jnp.float32),       # m_col
                           pltpu.VMEM((nj, 1, tn), jnp.float32),       # l_col
                           pltpu.VMEM((1, 1), jnp.float32)]            # acc_col
        # Column-direction state is shared across row tiles -> sequential grid.
        dim_sem = ("arbitrary", "arbitrary")
    else:
        # Row tiles are fully independent -> megacore-parallel i (v7x: 2 TCs).
        dim_sem = ("parallel", "arbitrary")

    kernel = functools.partial(_w2v_lse_kernel,
                               bidirectional=use_bidirectional_loss,
                               block_kv=tn,
                               ys_resident=ys_resident)

    grid_spec = pltpu.PrefetchScalarGridSpec(
        num_scalar_prefetch=0,
        grid=(ni, nj),
        in_specs=in_specs,
        out_specs=out_specs,
        scratch_shapes=scratch_shapes)

    outs = pl.pallas_call(
        kernel,
        out_shape=tuple(out_shape),
        grid_spec=grid_spec,
        compiler_params=pltpu.CompilerParams(dimension_semantics=dim_sem),
    )(xs_c, ys_c)

    row_lse = outs[0][:, 0]                                        # (B,)
    fwd = jnp.mean(row_lse - diag)
    if use_bidirectional_loss:
        col_lse_sum = outs[1][0, 0]
        bwd = (col_lse_sum - jnp.sum(diag)) / b
        return 0.5 * (fwd + bwd)
    return fwd


class Word2VecJAX:
    """JAX/Pallas port of the PyTorch Word2Vec module (forward pass)."""

    def __init__(self, num_embeddings, hidden_size=32,
                 use_bidirectional_loss=False, key=None):
        if key is None:
            key = jax.random.PRNGKey(0)
        k_src, k_tgt = jax.random.split(key)
        # nn.Embedding default init: N(0, 1).  Parameters stay f32 (matching
        # the PyTorch module); the loss kernel consumes bf16 casts.
        self.src_embeddings = jax.random.normal(
            k_src, (num_embeddings, hidden_size), dtype=jnp.float32)
        self.tgt_embeddings = jax.random.normal(
            k_tgt, (num_embeddings, hidden_size), dtype=jnp.float32)
        self.use_bidirectional_loss = use_bidirectional_loss

    def __call__(self, src_words, tgt_words=None, block_q=None, block_kv=None,
                 compute_dtype=jnp.bfloat16):
        # TODO(synk): fuse this embedding gather into the kernel via scalar
        # prefetch (PrefetchScalarGridSpec + DMA gather) to avoid the extra
        # HBM round trip of the xs/ys activations.
        xs_embed = jnp.take(self.src_embeddings, src_words, axis=0)       # (B, H)
        loss = None
        if tgt_words is not None:
            ys_embed = jnp.take(self.tgt_embeddings, tgt_words, axis=0)   # (B, H)
            loss = word2vec_loss_pallas(
                xs_embed, ys_embed,
                use_bidirectional_loss=self.use_bidirectional_loss,
                block_q=block_q, block_kv=block_kv,
                compute_dtype=compute_dtype)
        return loss, xs_embed


def _reference_loss(xs, ys, bidirectional):
    logits = xs @ ys.T
    b = logits.shape[0]
    gold = jnp.arange(b)

    def ce(lgt):
        lse = jax.scipy.special.logsumexp(lgt, axis=1)
        return jnp.mean(lse - lgt[jnp.arange(b), gold])

    loss = ce(logits)
    if bidirectional:
        loss = (loss + ce(logits.T)) / 2.0
    return loss


if __name__ == "__main__":
    num_embeddings = 64
    hidden_size = 32
    batch = 16

    key = jax.random.PRNGKey(0)
    k_model, k_src, k_tgt = jax.random.split(key, 3)

    model = Word2VecJAX(num_embeddings, hidden_size=hidden_size,
                        use_bidirectional_loss=True, key=k_model)

    src_words = jax.random.randint(k_src, (batch,), 0, num_embeddings, jnp.int32)
    tgt_words = jax.random.randint(k_tgt, (batch,), 0, num_embeddings, jnp.int32)

    # Pure-JAX reference inputs (f32 and bf16-rounded).
    xs_ref = jnp.take(model.src_embeddings, src_words, axis=0)
    ys_ref = jnp.take(model.tgt_embeddings, tgt_words, axis=0)
    xs_bf = xs_ref.astype(jnp.bfloat16).astype(jnp.float32)
    ys_bf = ys_ref.astype(jnp.bfloat16).astype(jnp.float32)

    ref_bi_f32 = _reference_loss(xs_ref, ys_ref, bidirectional=True)
    ref_fwd_f32 = _reference_loss(xs_ref, ys_ref, bidirectional=False)
    ref_bi_bf = _reference_loss(xs_bf, ys_bf, bidirectional=True)

    # 1) Default bf16 operands, 2x2 tiled grid, bidirectional, ys resident.
    loss, xs_embed = model(src_words, tgt_words, block_q=8, block_kv=8)
    loss = jax.block_until_ready(loss)
    xs_embed = jax.block_until_ready(xs_embed)
    assert xs_embed.shape == (batch, hidden_size)
    assert jnp.allclose(xs_embed, xs_ref, rtol=1e-6, atol=1e-6)
    assert jnp.allclose(loss, ref_bi_bf, rtol=2e-3, atol=2e-3), (loss, ref_bi_bf)
    assert abs(float(loss) - float(ref_bi_f32)) < 0.5, (loss, ref_bi_f32)

    # 2) f32 operands, forward-only CE, tiled, ys streamed (non-resident path).
    loss_fwd = word2vec_loss_pallas(
        xs_ref, ys_ref, use_bidirectional_loss=False,
        block_q=8, block_kv=8, compute_dtype=jnp.float32, ys_resident=False)
    loss_fwd = jax.block_until_ready(loss_fwd)
    assert jnp.allclose(loss_fwd, ref_fwd_f32, rtol=1e-4, atol=1e-4), (loss_fwd, ref_fwd_f32)

    # 3) f32, bidirectional, asymmetric tiles (tm != tn).
    loss_bi32 = word2vec_loss_pallas(
        xs_ref, ys_ref, use_bidirectional_loss=True,
        block_q=16, block_kv=8, compute_dtype=jnp.float32)
    loss_bi32 = jax.block_until_ready(loss_bi32)
    assert jnp.allclose(loss_bi32, ref_bi_f32, rtol=1e-4, atol=1e-4), (loss_bi32, ref_bi_f32)

    # 4) Default (auto) tile selection -> single-tile path for B=16.
    loss_1t = word2vec_loss_pallas(
        xs_ref, ys_ref, use_bidirectional_loss=True, compute_dtype=jnp.float32)
    loss_1t = jax.block_until_ready(loss_1t)
    assert jnp.allclose(loss_1t, ref_bi_f32, rtol=1e-4, atol=1e-4), (loss_1t, ref_bi_f32)

    # 5) No-target path: loss is None, embeddings returned.
    none_loss, emb_only = model(src_words)
    emb_only = jax.block_until_ready(emb_only)
    assert none_loss is None and emb_only.shape == (batch, hidden_size)

    print("KERNEL_OK")
</pallas_src>

<mosaic_0001>
module attributes {stable_mosaic.version = 11 : i64} {
  func.func @_w2v_lse_kernel(%arg0: i32, %arg1: i32, %arg2: memref<8x32xbf16, #tpu.memory_space<vmem>>, %arg3: memref<16x32xbf16, #tpu.memory_space<vmem>>, %arg4: memref<8x1xf32, #tpu.memory_space<vmem>>, %arg5: memref<1x1xf32, #tpu.memory_space<vmem>>, %arg6: memref<8x1xf32, #tpu.memory_space<vmem>>, %arg7: memref<8x1xf32, #tpu.memory_space<vmem>>, %arg8: memref<2x1x8xf32, #tpu.memory_space<vmem>>, %arg9: memref<2x1x8xf32, #tpu.memory_space<vmem>>, %arg10: memref<1x1xf32, #tpu.memory_space<vmem>>) attributes {dimension_semantics = [#tpu.dimension_semantics<arbitrary>, #tpu.dimension_semantics<arbitrary>], iteration_bounds = array<i64: 2, 2>, scalar_prefetch = 0 : i64, scratch_operands = 5 : i64, tpu.core_type = #tpu.core_type<tc>, window_params = [{transform_indices = @transform_0, window_bounds = array<i64: 8, 32>}, {pipeline_mode = #tpu.pipeline_mode<synchronous>, transform_indices = @transform_1, window_bounds = array<i64: 16, 32>}, {transform_indices = @transform_2, window_bounds = array<i64: 8, 1>}, {pipeline_mode = #tpu.pipeline_mode<synchronous>, transform_indices = @transform_3, window_bounds = array<i64: 1, 1>}]} {
    %c0 = arith.constant 0 : index
    %c0_0 = arith.constant 0 : index
    %0 = vector.load %arg2[%c0, %c0_0] : memref<8x32xbf16, #tpu.memory_space<vmem>>, vector<8x32xbf16>
    %c8_i32 = arith.constant 8 : i32
    %1 = arith.muli %arg1, %c8_i32 : i32
    %2 = tpu.assume_multiple %1, 8 : i32
    %3 = arith.index_cast %2 : i32 to index
    %c0_1 = arith.constant 0 : index
    %4 = vector.load %arg3[%3, %c0_1] : memref<16x32xbf16, #tpu.memory_space<vmem>>, vector<8x32xbf16>
    %cst = arith.constant dense<0.000000e+00> : vector<8x8xf32>
    %5 = tpu.matmul %0, %4, %cst {dimension_numbers = #tpu.dot_dimension_numbers<[1], [1], [0], [0], [0, 0, 1, 0], [], []>} : vector<8x32xbf16>, vector<8x32xbf16>, vector<8x8xf32> -> vector<8x8xf32>
    %c0_i32 = arith.constant 0 : i32
    %6 = arith.cmpi eq, %arg1, %c0_i32 : i32
    %7 = arith.extui %6 : i1 to i32
    %c0_i32_2 = arith.constant 0 : i32
    %8 = arith.cmpi ne, %7, %c0_i32_2 : i32
    scf.if %8 {
      %cst_34 = arith.constant 0xFF800000 : f32
      %77 = vector.broadcast %cst_34 : f32 to vector<8x1xf32>
      %c0_35 = arith.constant 0 : index
      %c0_36 = arith.constant 0 : index
      %78 = vector.load %arg6[%c0_35, %c0_36] : memref<8x1xf32, #tpu.memory_space<vmem>>, vector<8x1xf32>
      tpu.vector_store %arg6[%c0_35, %c0_36], %77 {strides = array<i32>} : memref<8x1xf32, #tpu.memory_space<vmem>>, vector<8x1xf32>,
      %cst_37 = arith.constant 0.000000e+00 : f32
      %79 = vector.broadcast %cst_37 : f32 to vector<8x1xf32>
      %c0_38 = arith.constant 0 : index
      %c0_39 = arith.constant 0 : index
      %80 = vector.load %arg7[%c0_38, %c0_39] : memref<8x1xf32, #tpu.memory_space<vmem>>, vector<8x1xf32>
      tpu.vector_store %arg7[%c0_38, %c0_39], %79 {strides = array<i32>} : memref<8x1xf32, #tpu.memory_space<vmem>>, vector<8x1xf32>,
    } else {
    }
    %cst_3 = arith.constant dense<0xFF800000> : vector<8xf32>
    %9 = vector.multi_reduction <maximumf>, %5, %cst_3 [1] : vector<8x8xf32> to vector<8xf32>
    %10 = vector.shape_cast %9 : vector<8xf32> to vector<8x1xf32>
    %cst_4 = arith.constant dense<0xFF800000> : vector<1xf32>
    %11 = vector.multi_reduction <maximumf>, %10, %cst_4 [0] : vector<8x1xf32> to vector<1xf32>
    %12 = vector.shape_cast %11 : vector<1xf32> to vector<1x1xf32>
    %13 = vector.broadcast %12 : vector<1x1xf32> to vector<8x8xf32>
    %14 = arith.subf %5, %13 : vector<8x8xf32>
    %15 = math.exp %14 : vector<8x8xf32>
    %cst_5 = arith.constant dense<0.000000e+00> : vector<8xf32>
    %16 = vector.multi_reduction <add>, %15, %cst_5 [1] : vector<8x8xf32> to vector<8xf32>
    %17 = vector.shape_cast %16 : vector<8xf32> to vector<8x1xf32>
    %cst_6 = arith.constant dense<0.000000e+00> : vector<8xf32>
    %18 = vector.multi_reduction <add>, %15, %cst_6 [0] : vector<8x8xf32> to vector<8xf32>
    %19 = vector.shape_cast %18 : vector<8xf32> to vector<1x8xf32>
    %c0_7 = arith.constant 0 : index
    %c0_8 = arith.constant 0 : index
    %20 = vector.load %arg6[%c0_7, %c0_8] : memref<8x1xf32, #tpu.memory_space<vmem>>, vector<8x1xf32>
    %21 = vector.broadcast %12 : vector<1x1xf32> to vector<8x1xf32>
    %22 = arith.maximumf %20, %21 : vector<8x1xf32>
    %c0_9 = arith.constant 0 : index
    %c0_10 = arith.constant 0 : index
    %23 = vector.load %arg7[%c0_9, %c0_10] : memref<8x1xf32, #tpu.memory_space<vmem>>, vector<8x1xf32>
    %24 = arith.subf %20, %22 : vector<8x1xf32>
    %25 = math.exp %24 : vector<8x1xf32>
    %26 = arith.mulf %23, %25 : vector<8x1xf32>
    %27 = vector.broadcast %12 : vector<1x1xf32> to vector<8x1xf32>
    %28 = arith.subf %27, %22 : vector<8x1xf32>
    %29 = math.exp %28 : vector<8x1xf32>
    %30 = arith.mulf %17, %29 : vector<8x1xf32>
    %31 = arith.addf %26, %30 : vector<8x1xf32>
    %c0_11 = arith.constant 0 : index
    %c0_12 = arith.constant 0 : index
    %32 = vector.load %arg7[%c0_11, %c0_12] : memref<8x1xf32, #tpu.memory_space<vmem>>, vector<8x1xf32>
    tpu.vector_store %arg7[%c0_11, %c0_12], %31 {strides = array<i32>} : memref<8x1xf32, #tpu.memory_space<vmem>>, vector<8x1xf32>,
    %c0_13 = arith.constant 0 : index
    %c0_14 = arith.constant 0 : index
    %33 = vector.load %arg6[%c0_13, %c0_14] : memref<8x1xf32, #tpu.memory_space<vmem>>, vector<8x1xf32>
    tpu.vector_store %arg6[%c0_13, %c0_14], %22 {strides = array<i32>} : memref<8x1xf32, #tpu.memory_space<vmem>>, vector<8x1xf32>,
    %c0_i32_15 = arith.constant 0 : i32
    %34 = arith.cmpi eq, %arg0, %c0_i32_15 : i32
    %c0_i32_16 = arith.constant 0 : i32
    %35 = arith.cmpi eq, %arg1, %c0_i32_16 : i32
    %36 = arith.andi %34, %35 : i1
    %37 = arith.extui %36 : i1 to i32
    %c0_i32_17 = arith.constant 0 : i32
    %38 = arith.cmpi ne, %37, %c0_i32_17 : i32
    scf.if %38 {
      %cst_34 = arith.constant 0.000000e+00 : f32
      %77 = vector.broadcast %cst_34 : f32 to vector<1x1xf32>
      %c0_35 = arith.constant 0 : index
      %c0_36 = arith.constant 0 : index
      %78 = vector.load %arg10[%c0_35, %c0_36] : memref<1x1xf32, #tpu.memory_space<vmem>>, vector<1x1xf32>
      tpu.vector_store %arg10[%c0_35, %c0_36], %77 {strides = array<i32>} : memref<1x1xf32, #tpu.memory_space<vmem>>, vector<1x1xf32>,
    } else {
    }
    %c0_i32_18 = arith.constant 0 : i32
    %39 = arith.cmpi eq, %arg0, %c0_i32_18 : i32
    %40 = arith.extui %39 : i1 to i32
    %c0_i32_19 = arith.constant 0 : i32
    %41 = arith.cmpi ne, %40, %c0_i32_19 : i32
    scf.if %41 {
      %cst_34 = arith.constant 0xFF800000 : f32
      %77 = vector.broadcast %cst_34 : f32 to vector<1x8xf32>
      %78 = arith.index_cast %arg1 : i32 to index
      %c0_35 = arith.constant 0 : index
      %c0_36 = arith.constant 0 : index
      %79 = vector.load %arg8[%78, %c0_35, %c0_36] : memref<2x1x8xf32, #tpu.memory_space<vmem>>, vector<1x1x8xf32>
      %80 = vector.shape_cast %79 : vector<1x1x8xf32> to vector<1x8xf32>
      %81 = vector.shape_cast %77 : vector<1x8xf32> to vector<1x1x8xf32>
      tpu.vector_store %arg8[%78, %c0_35, %c0_36], %81 {strides = array<i32>} : memref<2x1x8xf32, #tpu.memory_space<vmem>>, vector<1x1x8xf32>,
      %cst_37 = arith.constant 0.000000e+00 : f32
      %82 = vector.broadcast %cst_37 : f32 to vector<1x8xf32>
      %83 = arith.index_cast %arg1 : i32 to index
      %c0_38 = arith.constant 0 : index
      %c0_39 = arith.constant 0 : index
      %84 = vector.load %arg9[%83, %c0_38, %c0_39] : memref<2x1x8xf32, #tpu.memory_space<vmem>>, vector<1x1x8xf32>
      %85 = vector.shape_cast %84 : vector<1x1x8xf32> to vector<1x8xf32>
      %86 = vector.shape_cast %82 : vector<1x8xf32> to vector<1x1x8xf32>
      tpu.vector_store %arg9[%83, %c0_38, %c0_39], %86 {strides = array<i32>} : memref<2x1x8xf32, #tpu.memory_space<vmem>>, vector<1x1x8xf32>,
    } else {
    }
    %42 = arith.index_cast %arg1 : i32 to index
    %c0_20 = arith.constant 0 : index
    %c0_21 = arith.constant 0 : index
    %43 = vector.load %arg8[%42, %c0_20, %c0_21] : memref<2x1x8xf32, #tpu.memory_space<vmem>>, vector<1x1x8xf32>
    %44 = vector.shape_cast %43 : vector<1x1x8xf32> to vector<1x8xf32>
    %45 = vector.broadcast %12 : vector<1x1xf32> to vector<1x8xf32>
    %46 = arith.maximumf %44, %45 : vector<1x8xf32>
    %47 = arith.index_cast %arg1 : i32 to index
    %c0_22 = arith.constant 0 : index
    %c0_23 = arith.constant 0 : index
    %48 = vector.load %arg9[%47, %c0_22, %c0_23] : memref<2x1x8xf32, #tpu.memory_space<vmem>>, vector<1x1x8xf32>
    %49 = vector.shape_cast %48 : vector<1x1x8xf32> to vector<1x8xf32>
    %50 = arith.subf %44, %46 : vector<1x8xf32>
    %51 = math.exp %50 : vector<1x8xf32>
    %52 = arith.mulf %49, %51 : vector<1x8xf32>
    %53 = vector.broadcast %12 : vector<1x1xf32> to vector<1x8xf32>
    %54 = arith.subf %53, %46 : vector<1x8xf32>
    %55 = math.exp %54 : vector<1x8xf32>
    %56 = arith.mulf %19, %55 : vector<1x8xf32>
    %57 = arith.addf %52, %56 : vector<1x8xf32>
    %58 = arith.index_cast %arg1 : i32 to index
    %c0_24 = arith.constant 0 : index
    %c0_25 = arith.constant 0 : index
    %59 = vector.load %arg8[%58, %c0_24, %c0_25] : memref<2x1x8xf32, #tpu.memory_space<vmem>>, vector<1x1x8xf32>
    %60 = vector.shape_cast %59 : vector<1x1x8xf32> to vector<1x8xf32>
    %61 = vector.shape_cast %46 : vector<1x8xf32> to vector<1x1x8xf32>
    tpu.vector_store %arg8[%58, %c0_24, %c0_25], %61 {strides = array<i32>} : memref<2x1x8xf32, #tpu.memory_space<vmem>>, vector<1x1x8xf32>,
    %62 = arith.index_cast %arg1 : i32 to index
    %c0_26 = arith.constant 0 : index
    %c0_27 = arith.constant 0 : index
    %63 = vector.load %arg9[%62, %c0_26, %c0_27] : memref<2x1x8xf32, #tpu.memory_space<vmem>>, vector<1x1x8xf32>
    %64 = vector.shape_cast %63 : vector<1x1x8xf32> to vector<1x8xf32>
    %65 = vector.shape_cast %57 : vector<1x8xf32> to vector<1x1x8xf32>
    tpu.vector_store %arg9[%62, %c0_26, %c0_27], %65 {strides = array<i32>} : memref<2x1x8xf32, #tpu.memory_space<vmem>>, vector<1x1x8xf32>,
    %c1_i32 = arith.constant 1 : i32
    %66 = arith.cmpi eq, %arg0, %c1_i32 : i32
    %67 = arith.extui %66 : i1 to i32
    %c0_i32_28 = arith.constant 0 : i32
    %68 = arith.cmpi ne, %67, %c0_i32_28 : i32
    scf.if %68 {
      %77 = math.log %57 : vector<1x8xf32>
      %78 = arith.addf %46, %77 : vector<1x8xf32>
      %c0_34 = arith.constant 0 : index
      %c0_35 = arith.constant 0 : index
      %79 = vector.load %arg10[%c0_34, %c0_35] : memref<1x1xf32, #tpu.memory_space<vmem>>, vector<1x1xf32>
      %cst_36 = arith.constant dense<0.000000e+00> : vector<1xf32>
      %80 = vector.multi_reduction <add>, %78, %cst_36 [1] : vector<1x8xf32> to vector<1xf32>
      %81 = vector.shape_cast %80 : vector<1xf32> to vector<1x1xf32>
      %82 = arith.addf %79, %81 : vector<1x1xf32>
      %c0_37 = arith.constant 0 : index
      %c0_38 = arith.constant 0 : index
      %83 = vector.load %arg10[%c0_37, %c0_38] : memref<1x1xf32, #tpu.memory_space<vmem>>, vector<1x1xf32>
      tpu.vector_store %arg10[%c0_37, %c0_38], %82 {strides = array<i32>} : memref<1x1xf32, #tpu.memory_space<vmem>>, vector<1x1xf32>,
    } else {
    }
    %c1_i32_29 = arith.constant 1 : i32
    %69 = arith.cmpi eq, %arg0, %c1_i32_29 : i32
    %c1_i32_30 = arith.constant 1 : i32
    %70 = arith.cmpi eq, %arg1, %c1_i32_30 : i32
    %71 = arith.andi %69, %70 : i1
    %72 = arith.extui %71 : i1 to i32
    %c0_i32_31 = arith.constant 0 : i32
    %73 = arith.cmpi ne, %72, %c0_i32_31 : i32
    scf.if %73 {
      %c0_34 = arith.constant 0 : index
      %c0_35 = arith.constant 0 : index
      %77 = vector.load %arg10[%c0_34, %c0_35] : memref<1x1xf32, #tpu.memory_space<vmem>>, vector<1x1xf32>
      %c0_36 = arith.constant 0 : index
      %c0_37 = arith.constant 0 : index
      %78 = vector.load %arg5[%c0_36, %c0_37] : memref<1x1xf32, #tpu.memory_space<vmem>>, vector<1x1xf32>
      tpu.vector_store %arg5[%c0_36, %c0_37], %77 {strides = array<i32>} : memref<1x1xf32, #tpu.memory_space<vmem>>, vector<1x1xf32>,
    } else {
    }
    %c1_i32_32 = arith.constant 1 : i32
    %74 = arith.cmpi eq, %arg1, %c1_i32_32 : i32
    %75 = arith.extui %74 : i1 to i32
    %c0_i32_33 = arith.constant 0 : i32
    %76 = arith.cmpi ne, %75, %c0_i32_33 : i32
    scf.if %76 {
      %c0_34 = arith.constant 0 : index
      %c0_35 = arith.constant 0 : index
      %77 = vector.load %arg6[%c0_34, %c0_35] : memref<8x1xf32, #tpu.memory_space<vmem>>, vector<8x1xf32>
      %c0_36 = arith.constant 0 : index
      %c0_37 = arith.constant 0 : index
      %78 = vector.load %arg7[%c0_36, %c0_37] : memref<8x1xf32, #tpu.memory_space<vmem>>, vector<8x1xf32>
      %79 = math.log %78 : vector<8x1xf32>
      %80 = arith.addf %77, %79 : vector<8x1xf32>
      %c0_38 = arith.constant 0 : index
      %c0_39 = arith.constant 0 : index
      %81 = vector.load %arg4[%c0_38, %c0_39] : memref<8x1xf32, #tpu.memory_space<vmem>>, vector<8x1xf32>
      tpu.vector_store %arg4[%c0_38, %c0_39], %80 {strides = array<i32>} : memref<8x1xf32, #tpu.memory_space<vmem>>, vector<8x1xf32>,
    } else {
    }
    return
  }
  func.func @transform_0(%arg0: i32, %arg1: i32) -> (i32, i32) {
    %c0_i32 = arith.constant 0 : i32
    %c0_i32_0 = arith.constant 0 : i32
    return %arg0, %c0_i32 : i32, i32
  }
  func.func @transform_1(%arg0: i32, %arg1: i32) -> (i32, i32) {
    %c0_i32 = arith.constant 0 : i32
    %c0_i32_0 = arith.constant 0 : i32
    %c0_i32_1 = arith.constant 0 : i32
    return %c0_i32, %c0_i32_0 : i32, i32
  }
  func.func @transform_2(%arg0: i32, %arg1: i32) -> (i32, i32) {
    %c0_i32 = arith.constant 0 : i32
    %c0_i32_0 = arith.constant 0 : i32
    return %arg0, %c0_i32 : i32, i32
  }
  func.func @transform_3(%arg0: i32, %arg1: i32) -> (i32, i32) {
    %c0_i32 = arith.constant 0 : i32
    %c0_i32_0 = arith.constant 0 : i32
    %c0_i32_1 = arith.constant 0 : i32
    return %c0_i32, %c0_i32_0 : i32, i32
  }
}

</mosaic_0001>

<bundles_post_ra>
// kernel: tpu_custom_call.1
= control target key start
LH: loop header
LB: loop body
LE: loop exit
PB: predicated region body
PF: predicated region fallthrough
CT: control target
= control target key end

     0   :  { %9 = vsyncpa [#allocation8], 0  ;;  %s965_s0 = inlined_call_operand.hbm [shape: bf16[16,32], index: 0, kind: input, shape index: {}]   ;;  %s966_s1 = inlined_call_operand.hbm [shape: bf16[16,32], index: 1, kind: input, shape index: {}]   ;;  %s967_s2 = inlined_call_operand.vmem [shape: f32[16,1], index: 2, kind: output, shape index: {0}]   ;;  %s968_s3 = inlined_call_operand.hbm [shape: f32[1,1], index: 3, kind: output, shape index: {1}]  }
   0x1   :  { %11 = vsyncpa [#allocation8 + $0x1], 0 }
   0x2   :  { %12 = vsyncpa [#allocation11], 0 }
   0x3   :  { %13 = vsyncpa [#allocation9], 0  ;;  %s794_s12 = smov 0   ;;  %s796_s13 = smov 0  }
   0x4   :  { %s798_s14 = smov 0   ;;  %s800_s15 = smov 0  }
   0x5   :  { %s802_s16 = smov 0   ;;  %s804_s17 = smov 0  }
   0x6   :  { %s806_s18 = smov 0   ;;  %s808_s19 = smov 0  }
   0x7 LB: > { %s469_s20 = sadd.s32 4294967295, %s763_s19   ;;  %p471_p0 = scmp.ge.s32.totalorder %s763_s19, 1  ;;  %s763_s19 = sphi %s808_s19, %s19_s19   ;;  %s759_s18 = sphi %s806_s18, %s979_s18   ;;  %s755_s17 = sphi %s804_s17, %s978_s17   ;;  %s751_s16 = sphi %s802_s16, %s977_s16   ;;  %s747_s15 = sphi %s800_s15, %s976_s15   ;;  %s743_s14 = sphi %s798_s14, %s975_s14   ;;  %s739_s13 = sphi %s796_s13, %s974_s13   ;;  %s735_s12 = sphi %s794_s12, %s973_s12  }
   0x8   : > { %p838_p1 = scmp.eq.s32.totalorder %s469_s20, 0  ;;  %p130_p2 = scmp.lt.s32.totalorder %s763_s19, 5 }
   0x9   : > { %s141_s24 = sshll.u32 %s966_s1, 4  ;;  %s765_s26 = smov [#allocation10]   ;;  %s142_s24 = int_to_ptr.hbm [resolvable:$true] %s141_s24 }
   0xa   : > { %p846_p3 = pnand %p471_p0, %p130_p2  ;;  %s143_s27 = sshll.u32 %s765_s26, 4  ;;  %s144_s27 = int_to_ptr.vmem [resolvable:$true] %s143_s27 }
   0xb   : > { %s766_s28 = smov 64   ;;  %s767_s29 = smov 4  }
   0xc   : > { %p501_p4 = pneg %p846_p3  ;;  %s28_s30 = sadd.s32 1, %s755_s17 }
   0xd   : > { %p29_p6 = scmp.ge.s32.totalorder %s28_s30, 2  ;;  %s31_s4 = sadd.s32 1, %s759_s18 }
   0xe   : > { %p502_p5 = pnand %p501_p4, %p838_p1  ;;  %s38_s5 = sadd.s32 1, %s743_s14 }
   0xf   : > { %s981_s30 = smov (%p29_p6, %s28_s30), 0  ;;  %s983_s4 = smov (!%p29_p6, %s31_s4), %s759_s18 }
  0x10   : > { %504 = dma.hbm_to_vmem [thread:$0]  (!%p502_p5), %s142_s24, 128, %s144_s27, [#allocation11], %s766_s28, %s766_s28, %s767_s29  }
  0x11   : > { %p45_p7 = scmp.ne.s32.totalorder %s743_s14, %s739_s13  ;;  %p51_p8 = scmp.ne.s32.totalorder %s739_s13, %s735_s12 }
  0x12   : > { %p33_p9 = scmp.ge.s32.totalorder %s983_s4, 2  ;;  %p46_p10 = scmp.eq.s32.totalorder %s763_s19, 0 }
  0x13   : > { %p867_p11 = por %p838_p1, %p51_p8  ;;  %p510_p12 = scmp.lt.s32.totalorder %s763_s19, 4 }
  0x14   : > { %s985_s4 = smov (%p33_p9, %s983_s4), 0  ;;  %s157_s7 = sand.u32 1, %s743_s14  }
  0x15   : > { %s475_s8 = sshll.u32 %s759_s18, 2  ;;  %s35_s9 = ssub.s32 %s759_s18, %s985_s4 }
  0x16   : > { %p47_p13 = por %p46_p10, %p45_p7  ;;  %p36_p0 = scmp.eq.s32.totalorder %s35_s9, 0 }
  0x17   : > { %s474_s10 = sshll.u32 %s157_s7, 2  ;;  %s165_s22 = scalar_lea.hbm %s965_s0, %s475_s8 }
  0x18   : > { %s882_s23 = scalar_select %p36_p0, %s743_s14, %s38_s5  }
  0x19   : > { %s167_s24 = sshll.u32 %s165_s22, 4  ;;  %s161_s26 = scalar_lea.vmem [#allocation7], %s474_s10  ;;  %s168_s24 = int_to_ptr.hbm [resolvable:$true] %s167_s24 }
  0x1a   : > { %s169_s27 = sshll.u32 %s161_s26, 4  ;;  %p506_p2 = pnand %p510_p12, %p47_p13  ;;  %s170_s27 = int_to_ptr.vmem [resolvable:$true] %s169_s27 }
  0x1b   : > { %s158_s28 = scalar_lea.sflag [#allocation8], %s157_s7  ;;  %178 = sbr.rel (%p846_p3) target bundleno = 654 (0x28e), region = 28 }
  0x1c   : > { %508 = dma.hbm_to_vmem [thread:$0]  (!%p506_p2), %s168_s24, 64, %s170_s27, %s158_s28  }
  0x1d   : > { %s180_s29 = sand.u32 (!%p846_p3), 1, %s739_s13  }
  0x1e   : > { %s477_s9 = sshll.u32 (!%p846_p3), %s180_s29, 2  ;;  %s181_s11 = scalar_lea.sflag (!%p846_p3), [#allocation8], %s180_s29 }
  0x1f   : > { %s184_s8 = scalar_lea.vmem (!%p846_p3), [#allocation7], %s477_s9 }
  0x20   : > { %722 = dma.done.wait (%p867_p11), %s181_s11, 64  }
  0x21   : > { %724 = vsyncadd (%p867_p11), %s181_s11, 4294967232 }
  0x22   : > { %726 = dma.done.wait (%p838_p1), [#allocation11], 128  }
  0x23   : > { %728 = vsyncadd (%p838_p1), [#allocation11], 4294967168  ;;  %p212_p3 = scmp.lt.s32.totalorder %s751_s16, 1  ;;  %s480_s25 = sshll.u32 %s747_s15, 3  ;;  %vm224_vm0 = vcmask 261120  }
  0x24   : > { %s219_s5 = sshra.s32 %s480_s25, 3  ;;  %v217_v2 = vld [vmem:[%s184_s8] sm:$0xf]  ;;  %p244_p1 = scmp.eq.s32.totalorder %s747_s15, 0 }
  0x25   : > { %s213_s7 = scalar_select %p212_p3, %s751_s16, 1 }
  0x26   : > { %s481_s10 = sshll.u32 %s219_s5, 2  ;;  %p483_p4 = scmp.ne.s32.totalorder %s747_s15, 0 }
  0x27   : > { %s479_s12 = sshll.u32 %s213_s7, 3  ;;  %s222_s26 = scalar_lea.vmem [#allocation10], %s481_s10 }
  0x28   : > { %s903_s6 = scalar_lea.vmem %s967_s2, %s479_s12  ;;  %v223_v0 = vld [vmem:[%s222_s26] sm:$0xf] }
  0x29   : > { %v229_v1 = vsel %vm224_vm0, %v223_v0, 0 }
  0x2a   : > { %238 = vmatpush.bf16.xpose.msra.mxu0 %v229_v1 }
  0x31   : > { %482 = vmatmul.msk.bf16.vlgmr.msra.gmra.mxu0 %vm224_vm0, %v217_v2 }
  0xae   : > { %v240_v3 = vpop.f32.mrf.mxu0 }
  0xb2   : > { %247 = sbr.rel (%p483_p4) target bundleno = 186 (0xba), region = 40 }
  0xb6   : > { %v242_v4 = vpop.f32.mrf.mxu0 }
  0xb7   : > { %vm248_vm1 = vcmask 7168   ;;  %v768_v5 = vmov -inf   ;;  %v769_v6 = vmov 0.0  }
  0xb8   : > { %249 = vst.msk [vmem:[#allocation2] sm:$0xff] %vm248_vm1, %v768_v5 }
  0xb9   : > { %250 = vst.msk [vmem:[#allocation3] sm:$0xff] %vm248_vm1, %v769_v6 }
  0xba PF: > { %vm251_vm2 = vcmask 64512   ;;  %vm285_vm3 = vcmask 7168   ;;  %p288_p5 = scmp.eq.s32.totalorder %s751_s16, 0 }
  0xbb   : > { %v252_v7 = vsel %vm251_vm2, %v240_v3, -inf }
  0xbc   : > { %253 = vmax.xlane.f32.xlu0 %v252_v7  ;;  %p912_p6 = pnand %p288_p5, %p244_p1 }
  0xbf   : > { %v273_v14 = vld [vmem:[#allocation2] sm:$0xff] }
  0xc0   : > { %v275_v32 = vld [vmem:[#allocation3] sm:$0xff] }
 0x12f   : > { %v254_v8 = vpop.xlane.xlu0 %253 }
 0x130   : > { %v255_v9 = vrot.slane %v254_v8, 4 }
 0x132   : > { %v256_v10 = vmax.f32 %v254_v8, %v255_v9 }
 0x134   : > { %v257_v11 = vrot.slane %v256_v10, 2 }
 0x136   : > { %v258_v12 = vmax.f32 %v256_v10, %v257_v11 }
 0x138   : > { %v259_v13 = vrot.slane %v258_v12, 1 }
 0x13a   : > { %v260_v15 = vmax.f32 %v258_v12, %v259_v13 }
 0x13c   : > { %v274_v16 = vmax.f32 %v273_v14, %v260_v15  ;;  %v261_v17 = vsub.f32 %v240_v3, %v260_v15 }
 0x13e   : > { %v262_v18 = vmul.f32 1.442695, %v261_v17  ;;  %v276_v19 = vsub.f32 %v273_v14, %v274_v16  ;;  %v280_v20 = vsub.f32 %v260_v15, %v274_v16  ;;  %287 = vst.msk [vmem:[#allocation2] sm:$0xff] %vm285_vm3, %v274_v16 }
 0x140   : > { %587 = vpow2.f32 %v262_v18  ;;  %v277_v29 = vmul.f32 1.442695, %v276_v19  ;;  %v281_v30 = vmul.f32 1.442695, %v280_v20 }
 0x142   : > { %589 = vpow2.f32 %v277_v29 }
 0x143   : > { %591 = vpow2.f32 %v281_v30 }
 0x146   : > { %v588_v21 = vpop.eup %587 }
 0x147   : > { %v264_v22 = vsel %vm251_vm2, %v588_v21, 0.0 }
 0x148   : > { %265 = vadd.xlane.f32.xlu0 %v264_v22  ;;  %v267_v23 = vrot.slane %v264_v22, 4  ;;  %v590_v31 = vpop.eup %589 }
 0x149   : > { %v592_v33 = vpop.eup %591  ;;  %v279_v35 = vmul.f32 %v590_v31, %v275_v32 }
 0x14a   : > { %v268_v24 = vadd.f32 %v267_v23, %v264_v22 }
 0x14c   : > { %v269_v25 = vrot.slane %v268_v24, 2 }
 0x14e   : > { %v270_v26 = vadd.f32 %v269_v25, %v268_v24 }
 0x150   : > { %v271_v27 = vrot.slane %v270_v26, 1 }
 0x152   : > { %v272_v28 = vadd.f32 %v271_v27, %v270_v26 }
 0x1bb   : > { %v266_v34 = vpop.xlane.xlu0 %265 }
 0x1bc   : > { %v283_v36 = vmul.f32 %v592_v33, %v266_v34  ;;  %292 = sbr.rel (%p912_p6) target bundleno = 451 (0x1c3), region = 44 }
 0x1be   : > { %v284_v37 = vadd.f32 %v283_v36, %v279_v35 }
 0x1c0   : > { %286 = vst.msk [vmem:[#allocation3] sm:$0xff] %vm285_vm3, %v284_v37 }
 0x1c1   : > { %vm293_vm4 = vcmask 0   ;;  %v770_v38 = vmov 0.0  }
 0x1c2   : > { %294 = vst.msk [vmem:[#allocation6] sm:$0x1] %vm293_vm4, %v770_v38 }
 0x1c3 PF: > { %p484_p7 = scmp.ne.s32.totalorder %s751_s16, 0 }
 0x1c4   : > { %s298_s27 = scalar_lea.vmem (!%p484_p7), [#allocation4], %s747_s15  ;;  %s301_s28 = scalar_lea.vmem (!%p484_p7), [#allocation5], %s747_s15 }
 0x1c5   : > { %297 = sbr.rel (%p484_p7) target bundleno = 461 (0x1cd), region = 48 }
 0x1ca   : > { %vm299_vm5 = vcmask 57344   ;;  %v771_v39 = vmov -inf   ;;  %v772_v40 = vmov 0.0  }
 0x1cb   : > { %300 = vst.msk [vmem:[%s298_s27] sm:$0x1] %vm299_vm5, %v771_v39 }
 0x1cc   : > { %302 = vst.msk [vmem:[%s301_s28] sm:$0x1] %vm299_vm5, %v772_v40 }
 0x1cd PF: > { %s303_s29 = scalar_lea.vmem [#allocation4], %s747_s15  ;;  %vm317_vm6 = vcmask 57344   ;;  %p320_p8 = scmp.eq.s32.totalorder %s751_s16, 1 }
 0x1ce   : > { %s306_s9 = scalar_lea.vmem [#allocation5], %s747_s15  ;;  %p485_p9 = scmp.ne.s32.totalorder %s751_s16, 1 }
 0x1d2   : > { %v304_v41 = vld [vmem:[%s303_s29] sm:$0x1] }
 0x1d3   : > { %v305_v42 = vmax.f32 %v304_v41, %v260_v15  ;;  %v307_v47 = vld [vmem:[%s306_s9] sm:$0x1] }
 0x1d5   : > { %v308_v43 = vsub.f32 %v304_v41, %v305_v42  ;;  %v312_v44 = vsub.f32 %v260_v15, %v305_v42  ;;  %318 = vst.msk [vmem:[%s303_s29] sm:$0x1] %vm317_vm6, %v305_v42 }
 0x1d7   : > { %v309_v45 = vmul.f32 1.442695, %v308_v43  ;;  %v313_v46 = vmul.f32 1.442695, %v312_v44 }
 0x1d9   : > { %593 = vpow2.f32 %v309_v45 }
 0x1da   : > { %595 = vpow2.f32 %v313_v46 }
 0x1df   : > { %v594_v48 = vpop.eup %593 }
 0x1e0   : > { %v596_v49 = vpop.eup %595  ;;  %v311_v50 = vmul.f32 %v594_v48, %v307_v47 }
 0x1e1   : > { %v315_v51 = vmul.f32 %v596_v49, %v272_v28  ;;  %323 = sbr.rel (%p485_p9) target bundleno = 617 (0x269), region = 52 }
 0x1e3   : > { %v316_v52 = vadd.f32 %v315_v51, %v311_v50 }
 0x1e5   : > { %319 = vst.msk [vmem:[%s306_s9] sm:$0x1] %vm317_vm6, %v316_v52 }
 0x1e6   : > { %597 = vlog2.f32 %v316_v52  ;;  %v327_v57 = vld [vmem:[#allocation6] sm:$0x1]  ;;  %vm332_vm7 = vcmask 0  }
 0x1ec   : > { %v598_v53 = vpop.eup %597 }
 0x1ed   : > { %v325_v54 = vmul.f32 0.6931472, %v598_v53 }
 0x1ef   : > { %v326_v55 = vadd.f32 %v325_v54, %v305_v42 }
 0x1f1   : > { %v328_v56 = vsel %vm317_vm6, %v326_v55, 0.0 }
 0x1f2   : > { %329 = vadd.xlane.f32.xlu0 %v328_v56 }
 0x265   : > { %v330_v58 = vpop.xlane.xlu0 %329 }
 0x266   : > { %v331_v59 = vadd.f32 %v330_v58, %v327_v57 }
 0x268   : > { %333 = vst.msk [vmem:[#allocation6] sm:$0x1] %vm332_vm7, %v331_v59 }
 0x269 PF: > { %p334_p10 = scmp.eq.s32.totalorder %s747_s15, 1 }
 0x26b   : > { %p335_p11 = pnand %p334_p10, %p320_p8 }
 0x26d   : > { %338 = sbr.rel (%p335_p11) target bundleno = 628 (0x274), region = 56 }
 0x272   : > { %v339_v60 = vld [vmem:[#allocation6] sm:$0x1]  ;;  %vm340_vm8 = vcmask 0  }
 0x273   : > { %341 = vst.msk [vmem:[#allocation12] sm:$0x1] %vm340_vm8, %v339_v60 }
 0x274 PF: > { %p486_p12 = scmp.ne.s32.totalorder %s747_s15, 1 }
 0x276   : > { %344 = sbr.rel (%p486_p12) target bundleno = 648 (0x288), region = 60 }
 0x27b   : > { %v346_v61 = vld [vmem:[#allocation3] sm:$0xff]  ;;  %v345_v63 = vld [vmem:[#allocation2] sm:$0xff] }
 0x27c   : > { %599 = vlog2.f32 %v346_v61 }
 0x282   : > { %v600_v62 = vpop.eup %599 }
 0x283   : > { %v348_v0 = vmul.f32 0.6931472, %v600_v62 }
 0x285   : > { %v349_v1 = vadd.f32 %v348_v0, %v345_v63 }
 0x287   : > { %350 = vst.msk [vmem:[%s903_s6] sm:$0xff] %vm285_vm3, %v349_v1 }
 0x288 PF: > { %p512_p13 = scmp.eq.s32.totalorder %s469_s20, 3  ;;  %s366_s8 = sshll.u32 %s968_s3, 4  ;;  %s367_s8 = int_to_ptr.hbm [resolvable:$true] %s366_s8 }
 0x289   : > { %s773_s25 = smov [#allocation12]  }
 0x28a   : > { %s364_s15 = sshll.u32 %s773_s25, 4  ;;  %s365_s15 = int_to_ptr.vmem [resolvable:$true] %s364_s15 }
 0x28b   : > { %498 = dma.vmem_to_hbm [thread:$0]  (%p512_p13), %s365_s15, 16, %s367_s8, [#allocation9]  }
 0x28c   : > { %730 = dma.done.wait (%p512_p13), [#allocation9], 16  }
 0x28d   : > { %732 = vsyncadd (%p512_p13), [#allocation9], 4294967280 }
 0x28e PF: > { %s19_s19 = sadd.s32 1, %s763_s19   ;;  %s973_s12 = smov %s739_s13 }
 0x28f   : > { %p16_p0 = scmp.ge.s32.totalorder %s19_s19, 6   ;;  %s974_s13 = smov %s743_s14 }
 0x290   : > { %s975_s14 = smov %s882_s23  ;;  %s976_s15 = smov %s755_s17 }
 0x291   : > { %s977_s16 = smov %s759_s18  ;;  %s978_s17 = smov %s981_s30 }
 0x292   : > { %s979_s18 = smov %s985_s4  ;;  %18 = sbr.rel (!%p16_p0) target bundleno = 7 (0x7), region = 110 }
 0x297   :  { %387 = vsyncpa [#allocation8], 1 }
 0x298   :  { %389 = vsyncpa [#allocation8 + $0x1], 1 }
 0x299   :  { %390 = vsyncpa [#allocation11], 1 }
 0x29a   :  { %391 = vsyncpa [#allocation9], 1 }
 0x29b   :  { %393 = vsyncpa [#allocation9 + $0x1], 1 }

</bundles_post_ra>
